<compile_context>
chip_gen: v7x
topology: tpu7x:2x2x1
jax: 0.10.0
libtpu: 0.0.40
codegen_flags: <defaults>
</compile_context>

<pallas_src>
import functools

import jax
import jax.numpy as jnp
from jax.experimental import pallas as pl
from jax.experimental.pallas import tpu as pltpu


_LANE = 128
_SUBLANE = 8
# Below this many rows: grid-less call (zero pipeline prologue/epilogue).
# Above it: always >=2 even grid steps so v7x's 2 TensorCores both get work.
_FAST_PATH_MAX_ROWS = 2048


def _round_up(n, m):
    return ((n + m - 1) // m) * m


def _hyper_weights_kernel(x_ref, wt_ref, b_ref, o_ref):
    # x_ref : [TB, D_in]        (VMEM tile of the batch)
    # wt_ref: [D_in, D_out_pad] (VMEM, resident across all grid steps)
    # b_ref : [1,    D_out_pad] (VMEM, resident)
    # o_ref : [TB, D_out_pad]   lane-dense (D_out_pad % 128 == 0) -> full vst
    acc = jnp.dot(x_ref[...], wt_ref[...], preferred_element_type=jnp.float32)
    o_ref[...] = jnp.abs(acc + b_ref[...]).astype(o_ref.dtype)


def prepare_params(w, b, param_dtype=None):
    """One-time parameter prep (NOT in the per-forward hot path).

    w: [D_out, D_in], b: [D_out]  ->  w_t_pad: [D_in, D_out_pad],
                                      b_pad:   [1, D_out_pad]
    D_out is zero-padded to a multiple of 128 for lane-dense MXU/store;
    padded columns compute abs(0 + 0) = 0 and are sliced off outside.

    To fuse several hyper-heads (QMIX hyper_w1/w2/b1/b2), concatenate their
    W along D_out and their b along D_out *before* calling this, run one
    apply, then split the output columns — x is then read from HBM once.

    param_dtype=jnp.bfloat16 halves resident weight VMEM and removes MXU
    f32 decomposition passes (free to produce here, off the hot path).
    """
    d_out, _ = w.shape
    d_out_pad = _round_up(d_out, _LANE)
    w_t_pad = jnp.pad(jnp.transpose(w), ((0, 0), (0, d_out_pad - d_out)))
    b_pad = jnp.pad(b, (0, d_out_pad - d_out)).reshape(1, d_out_pad)
    if param_dtype is not None:
        w_t_pad = w_t_pad.astype(param_dtype)
        b_pad = b_pad.astype(param_dtype)
    return w_t_pad, b_pad


@functools.partial(jax.jit, static_argnames=("d_out", "block_b", "out_dtype"))
def hypernetwork_for_weights_apply(x, w_t_pad, b_pad, *, d_out,
                                   block_b=4096, out_dtype=None):
    """x: [B, D_in] -> abs(x @ W^T + b): [B, d_out]."""
    B, D_in = x.shape
    D_out_pad = w_t_pad.shape[1]
    out_dtype = x.dtype if out_dtype is None else out_dtype

    if B <= _FAST_PATH_MAX_ROWS:
        # Single block, no grid, no pipeline machinery: operands whole in VMEM.
        out_pad = pl.pallas_call(
            _hyper_weights_kernel,
            out_shape=jax.ShapeDtypeStruct((B, D_out_pad), out_dtype),
            in_specs=[
                pl.BlockSpec(memory_space=pltpu.MemorySpace.VMEM),
                pl.BlockSpec(memory_space=pltpu.MemorySpace.VMEM),
                pl.BlockSpec(memory_space=pltpu.MemorySpace.VMEM),
            ],
            out_specs=pl.BlockSpec(memory_space=pltpu.MemorySpace.VMEM),
        )(x, w_t_pad, b_pad)
    else:
        # Gridded path: tile the batch dim; tiny weights/bias stay resident
        # (constant index_map). No jnp.pad of x: cdiv grid + Pallas's masked
        # write on the ragged last block (garbage rows are never stored).
        num_steps = max(2, pl.cdiv(B, block_b))
        if num_steps % 2:
            num_steps += 1  # even step count keeps v7x's two TCs balanced
        tb = _round_up(pl.cdiv(B, num_steps), _SUBLANE)
        out_pad = pl.pallas_call(
            _hyper_weights_kernel,
            out_shape=jax.ShapeDtypeStruct((B, D_out_pad), out_dtype),
            grid=(pl.cdiv(B, tb),),
            in_specs=[
                pl.BlockSpec((tb, D_in), lambda i: (i, 0)),
                pl.BlockSpec((D_in, D_out_pad), lambda i: (0, 0)),
                pl.BlockSpec((1, D_out_pad), lambda i: (0, 0)),
            ],
            out_specs=pl.BlockSpec((tb, D_out_pad), lambda i: (i, 0)),
            compiler_params=pltpu.CompilerParams(
                dimension_semantics=("parallel",)
            ),
        )(x, w_t_pad, b_pad)

    if d_out != D_out_pad:
        # TODO(synk): consumers that accept the padded [B, D_out_pad] layout
        # (or head-fused d_out that is a 128 multiple) should skip this slice;
        # standalone it is an extra pass over the dominant output traffic.
        out_pad = out_pad[:, :d_out]
    return out_pad


if __name__ == "__main__":
    # Small shapes consistent with a QMIX hyper-network:
    #   state (input) dim = 32, output dim = 64 (e.g. n_agents * mixing_dim).
    batch, input_dim, output_dim = 8, 32, 64

    key = jax.random.PRNGKey(0)
    kx, kw, kb, kw2, kb2, kx2 = jax.random.split(key, 6)

    # Deterministic init (uniform, matching nn.Linear's fan_in bound).
    bound = 1.0 / (input_dim ** 0.5)
    w = jax.random.uniform(kw, (output_dim, input_dim), jnp.float32, -bound, bound)
    b = jax.random.uniform(kb, (output_dim,), jnp.float32, -bound, bound)
    x = jax.random.normal(kx, (batch, input_dim), jnp.float32)

    # --- 1) Small batch: grid-less fast path ------------------------------
    w_t_pad, b_pad = prepare_params(w, b)
    out = hypernetwork_for_weights_apply(x, w_t_pad, b_pad, d_out=output_dim)
    out = jax.block_until_ready(out)
    ref = jnp.abs(x @ w.T + b)
    assert out.shape == (batch, output_dim)
    assert jnp.allclose(out, ref, atol=1e-5, rtol=1e-5)

    # --- 2) Large ragged batch: gridded path (even steps, masked last block)
    big_batch = 3001  # > fast-path threshold, not a multiple of the tile
    xb = jax.random.normal(kx2, (big_batch, input_dim), jnp.float32)
    out_b = hypernetwork_for_weights_apply(xb, w_t_pad, b_pad, d_out=output_dim)
    out_b = jax.block_until_ready(out_b)
    ref_b = jnp.abs(xb @ w.T + b)
    assert out_b.shape == (big_batch, output_dim)
    assert jnp.allclose(out_b, ref_b, atol=1e-5, rtol=1e-5)

    # --- 3) Head fusion: two hyper-heads in ONE call (x read from HBM once,
    #        fused d_out = 128 -> no padded output columns at all) ----------
    w2 = jax.random.uniform(kw2, (output_dim, input_dim), jnp.float32, -bound, bound)
    b2 = jax.random.uniform(kb2, (output_dim,), jnp.float32, -bound, bound)
    w_fused = jnp.concatenate([w, w2], axis=0)        # [2*D_out, D_in]
    b_fused = jnp.concatenate([b, b2], axis=0)        # [2*D_out]
    wf_t_pad, bf_pad = prepare_params(w_fused, b_fused)
    out_f = hypernetwork_for_weights_apply(x, wf_t_pad, bf_pad,
                                           d_out=2 * output_dim)
    out_f = jax.block_until_ready(out_f)
    ref1 = jnp.abs(x @ w.T + b)
    ref2 = jnp.abs(x @ w2.T + b2)
    assert out_f.shape == (batch, 2 * output_dim)
    assert jnp.allclose(out_f[:, :output_dim], ref1, atol=1e-5, rtol=1e-5)
    assert jnp.allclose(out_f[:, output_dim:], ref2, atol=1e-5, rtol=1e-5)

    print("KERNEL_OK")
</pallas_src>

<mosaic_0001>
module attributes {stable_mosaic.version = 11 : i64} {
  func.func @_hyper_weights_kernel(%arg0: memref<8x32xf32, #tpu.memory_space<vmem>>, %arg1: memref<32x128xf32, #tpu.memory_space<vmem>>, %arg2: memref<1x128xf32, #tpu.memory_space<vmem>>, %arg3: memref<8x128xf32, #tpu.memory_space<vmem>>) attributes {dimension_semantics = [], scalar_prefetch = 0 : i64, scratch_operands = 0 : i64, tpu.core_type = #tpu.core_type<tc>} {
    %c0 = arith.constant 0 : index
    %c0_0 = arith.constant 0 : index
    %0 = vector.load %arg0[%c0, %c0_0] : memref<8x32xf32, #tpu.memory_space<vmem>>, vector<8x32xf32>
    %c0_1 = arith.constant 0 : index
    %c0_2 = arith.constant 0 : index
    %1 = vector.load %arg1[%c0_1, %c0_2] : memref<32x128xf32, #tpu.memory_space<vmem>>, vector<32x128xf32>
    %cst = arith.constant dense<0.000000e+00> : vector<8x128xf32>
    %2 = tpu.matmul %0, %1, %cst {dimension_numbers = #tpu.dot_dimension_numbers<[1], [0], [0], [1], [0, 0, 1, 1], [], []>} : vector<8x32xf32>, vector<32x128xf32>, vector<8x128xf32> -> vector<8x128xf32>
    %c0_3 = arith.constant 0 : index
    %c0_4 = arith.constant 0 : index
    %3 = vector.load %arg2[%c0_3, %c0_4] : memref<1x128xf32, #tpu.memory_space<vmem>>, vector<1x128xf32>
    %4 = vector.broadcast %3 : vector<1x128xf32> to vector<8x128xf32>
    %5 = arith.addf %2, %4 : vector<8x128xf32>
    %6 = math.absf %5 : vector<8x128xf32>
    %c0_5 = arith.constant 0 : index
    %c0_6 = arith.constant 0 : index
    %7 = vector.load %arg3[%c0_5, %c0_6] : memref<8x128xf32, #tpu.memory_space<vmem>>, vector<8x128xf32>
    tpu.vector_store %arg3[%c0_5, %c0_6], %6 {strides = array<i32>} : memref<8x128xf32, #tpu.memory_space<vmem>>, vector<8x128xf32>,
    return
  }
}

</mosaic_0001>

<bundles_post_ra>
// kernel: hypernetwork_for_weights_apply.1
= control target key start
LH: loop header
LB: loop body
LE: loop exit
PB: predicated region body
PF: predicated region fallthrough
CT: control target
= control target key end

     0   :  { %8 = vsyncpa [#allocation3], 0  ;;  %s323_s0 = inlined_call_operand.hbm [shape: f32[8,32], index: 0, kind: input, shape index: {}]   ;;  %s324_s1 = inlined_call_operand.hbm [shape: f32[32,128], index: 1, kind: input, shape index: {}]   ;;  %s325_s2 = inlined_call_operand.vmem [shape: f32[1,128], index: 2, kind: input, shape index: {}]   ;;  %s326_s3 = inlined_call_operand.hbm [shape: f32[8,128], index: 3, kind: output, shape index: {}]  }
   0x1   :  { %9 = vsyncpa [#allocation6], 0 }
   0x2   :  { %10 = vsyncpa [#allocation4], 0  ;;  %s249_s12 = smov [#allocation2]   ;;  %s250_s14 = smov [#allocation5]  }
   0x3   :  { %s17_s13 = sshll.u32 %s249_s12, 4  ;;  %s26_s15 = sshll.u32 %s250_s14, 4  ;;  %s18_s13 = int_to_ptr.vmem [resolvable:$true] %s17_s13  ;;  %s277_s15 = int_to_ptr.vmem [resolvable:$true] %s26_s15 }
   0x4   :  { %s177_s18 = scalar_lea.hbm %s323_s0, 128 }
   0x5   :  { %p178_p0 = scmp.ne.s32.totalorder %s323_s0, %s177_s18  ;;  %p181_p1 = scmp.lt.u32.totalorder %s177_s18, %s323_s0 }
   0x7   :  { %p183_p2 = pnand %p181_p1, %p178_p0 }
   0x9   :  { %186 = shalt.err (!%p183_p2)
}
   0xa   :  { %s187_s23 = scalar_lea.vmem %s18_s13, 128  ;;  %p192_p4 = scmp.lt.s32.totalorder %s18_s13, %s18_s13 }
   0xb   :  { %p188_p3 = scmp.ne.s32.totalorder %s18_s13, %s187_s23  ;;  %p193_p5 = scmp.lt.s32.totalorder %s187_s23, %s187_s23 }
   0xd   :  { %p194_p6 = por %p193_p5, %p192_p4 }
   0xf   :  { %p195_p7 = pnand %p194_p6, %p188_p3 }
  0x11   :  { %198 = shalt.err (!%p195_p7)
}
  0x12   :  { %20 = dma.hbm_to_vmem [thread:$0]  %s323_s0, 128, %s18_s13, [#allocation3]  }
  0x13   :  { %s199_s28 = scalar_lea.hbm %s324_s1, 512 }
  0x14   :  { %p200_p8 = scmp.ne.s32.totalorder %s324_s1, %s199_s28  ;;  %p203_p9 = scmp.lt.u32.totalorder %s199_s28, %s324_s1 }
  0x16   :  { %p205_p10 = pnand %p203_p9, %p200_p8 }
  0x18   :  { %208 = shalt.err (!%p205_p10)
}
  0x19   :  { %s209_s6 = scalar_lea.vmem %s277_s15, 512  ;;  %p214_p12 = scmp.lt.s32.totalorder %s277_s15, %s277_s15 }
  0x1a   :  { %p210_p11 = scmp.ne.s32.totalorder %s277_s15, %s209_s6  ;;  %p215_p13 = scmp.lt.s32.totalorder %s209_s6, %s209_s6 }
  0x1c   :  { %p216_p0 = por %p215_p13, %p214_p12 }
  0x1e   :  { %p217_p1 = pnand %p216_p0, %p210_p11 }
  0x20   :  { %220 = shalt.err (!%p217_p1)
}
  0x21   :  { %s251_s0 = smov 128   ;;  %s252_s7 = smov 8  }
  0x22   :  { %32 = dma.hbm_to_vmem [thread:$0]  %s324_s1, 512, %s277_s15, [#allocation6], %s251_s0, %s251_s0, %s252_s7  }
  0x23   :  { %243 = dma.done.wait [#allocation3], 128  }
  0x24   :  { %244 = vsyncadd [#allocation3], 4294967168 }
  0x25   :  { %245 = dma.done.wait [#allocation6], 512  }
  0x26   :  { %246 = vsyncadd [#allocation6], 4294966784  ;;  %v253_v0 = vmov 0.0|0.0   ;;  %vm254_vm0 = vmmov 0   ;;  %v255_v1 = vmov 0.0   ;;  %v42_v2 = vld [vmem:[#allocation5] sm:$0xff] }
  0x27   :  { %163 = vmatprep.subr.bf16.mxu0 %v253_v0  ;;  %160 = vmatprep.mubr.msk.f32.mxu0 %vm254_vm0, %v255_v1  ;;  %v43_v3 = vld [vmem:[#allocation5 + $0x8] sm:$0xff]  ;;  %v44_v4 = vld [vmem:[#allocation5 + $0x10] sm:$0xff]  ;;  %v45_v6 = vld [vmem:[#allocation5 + $0x18] sm:$0xff]  ;;  %vm53_vm1 = vcmask 261120   ;;  %s256_s11 = smov [#allocation7]  }
  0x28   :  { %v164_v5 = vpack.c.bf16 %v43_v3, %v42_v2  ;;  %v167_v7 = vpack.c.bf16 %v45_v6, %v44_v4  ;;  %v41_v8 = vld [vmem:[#allocation2] sm:$0xff]  ;;  %s135_s12 = sshll.u32 %s256_s11, 4  ;;  %s136_s12 = int_to_ptr.vmem [resolvable:$true] %s135_s12 }
  0x29   :  { %v145_v9 = vld [vmem:[%s325_s2] ss:$0 sm:$0xff]  ;;  %s221_s13 = scalar_lea.vmem %s136_s12, 128  ;;  %p226_p3 = scmp.lt.s32.totalorder %s136_s12, %s136_s12 }
  0x2a   :  { %165 = vmatpush3.bf16.msra.mxu0 %v164_v5  ;;  %p222_p2 = scmp.ne.s32.totalorder %s136_s12, %s221_s13  ;;  %p227_p4 = scmp.lt.s32.totalorder %s221_s13, %s221_s13 }
  0x2b   :  { %166 = vmatprep.subr.bf16.mxu0 %v253_v0 }
  0x2c   :  { %p228_p5 = por %p227_p4, %p226_p3 }
  0x2e   :  { %168 = vmatpush3.bf16.msra.mxu0 %v167_v7  ;;  %p229_p6 = pnand %p228_p5, %p222_p2 }
  0x31   :  { %161 = vmatmul.mubr.msk.f32.vlgmr.msra.gmra.mrb[0].mxu0 %vm53_vm1, %v41_v8 }
 0x104   :  { %v123_v10 = vpop.f32.mrb[0].mxu0 }
 0x105   :  { %v124_v11 = vadd.f32 %v145_v9, %v123_v10  ;;  %v162_v12 = vpop.f32.mrb[1].mxu0 }
 0x107   :  { %v127_v13 = vand.u32 2147483647, %v124_v11 }
 0x109   :  { %128 = vst [vmem:[#allocation7] sm:$0xff] %v127_v13 }
 0x10a   :  { %232 = shalt.err (!%p229_p6)
}
 0x10b   :  { %s233_s16 = scalar_lea.hbm %s326_s3, 128 }
 0x10c   :  { %p234_p7 = scmp.ne.s32.totalorder %s326_s3, %s233_s16  ;;  %p237_p8 = scmp.lt.u32.totalorder %s233_s16, %s326_s3 }
 0x10e   :  { %p239_p9 = pnand %p237_p8, %p234_p7 }
 0x110   :  { %242 = shalt.err (!%p239_p9)
}
 0x111   :  { %138 = dma.vmem_to_hbm [thread:$0]  %s136_s12, 128, %s326_s3, [#allocation4]  }
 0x112   :  { %247 = dma.done.wait [#allocation4], 128  }
 0x113   :  { %248 = vsyncadd [#allocation4], 4294967168 }
 0x114   :  { %142 = vsyncpa [#allocation3], 1 }
 0x115   :  { %143 = vsyncpa [#allocation6], 1 }
 0x116   :  { %144 = vsyncpa [#allocation4], 1 }

</bundles_post_ra>
